<compile_context>
chip_gen: v7x
topology: tpu7x:2x2x1
jax: 0.10.0
libtpu: 0.0.40
codegen_flags: <defaults>
</compile_context>

<pallas_src>
import functools
import math

import jax
import jax.numpy as jnp
from jax.experimental import pallas as pl
from jax.experimental.pallas import tpu as pltpu


# ---------------------------------------------------------------------------
# Kernel
# ---------------------------------------------------------------------------
def _gau_kernel(x_ref, wu_ref, wv_ref, wb_ref, wo_ref, gamma_ref, beta_ref,
                bias_ref, g_ref, rs_ref, o_ref, *, eps, sqrt_s, shortcut):
    bb, T, D = x_ref.shape
    e = wu_ref.shape[1]
    s = wb_ref.shape[1]
    Do = wo_ref.shape[1]

    x = x_ref[...].astype(jnp.float32)                        # (bb, T, D)

    # ---- ScaleNorm: x / clamp(||x||_2 * D^-0.5, eps) * g ---------------------
    norm = jnp.sqrt(jnp.sum(x * x, axis=-1, keepdims=True)) * (D ** -0.5)
    xn = x / jnp.maximum(norm, eps) * g_ref[...]              # g: (1,1) broadcast

    # ---- uv = Linear(xn); SiLU; split into u / v / base ----------------------
    # (split and the elementwise SiLU commute, so we use three separate matmuls
    #  against pre-split weight slabs — avoids in-kernel lane slicing.)
    xn2 = xn.reshape(bb * T, D)
    u = jnp.dot(xn2, wu_ref[...], preferred_element_type=jnp.float32)
    v = jnp.dot(xn2, wv_ref[...], preferred_element_type=jnp.float32)
    base = jnp.dot(xn2, wb_ref[...], preferred_element_type=jnp.float32)
    u = (u * jax.nn.sigmoid(u)).reshape(bb, T, e)
    v = (v * jax.nn.sigmoid(v)).reshape(bb, T, e)
    base = (base * jax.nn.sigmoid(base)).reshape(bb, T, s)

    # ---- q / k from the shared base via per-channel affine (gamma, beta) -----
    q = base * gamma_ref[0:1, :] + beta_ref[0:1, :]           # (bb, T, s)
    k = base * gamma_ref[1:2, :] + beta_ref[1:2, :]           # (bb, T, s)

    # ---- attention kernel: relu((q k^T + rel_bias) / sqrt(s)) ** 2 -----------
    qk = jnp.einsum('bqs,bks->bqk', q, k,
                    preferred_element_type=jnp.float32)       # (bb, T, T)
    qk = (qk + bias_ref[...]) / sqrt_s                        # bias: (T, T)
    kern = jnp.square(jnp.maximum(qk, 0.0))

    attn = jnp.einsum('bqk,bke->bqe', kern, v,
                      preferred_element_type=jnp.float32)     # (bb, T, e)
    gated = (u * attn).reshape(bb * T, e)

    out = jnp.dot(gated, wo_ref[...], preferred_element_type=jnp.float32)
    out = out.reshape(bb, T, Do)

    if shortcut:
        # Residual branch: Scale(x) = x * res_scale (fused here, no extra kernel)
        out = out + x * rs_ref[...]                           # rs: (1, D) broadcast

    o_ref[...] = out.astype(o_ref.dtype)


# ---------------------------------------------------------------------------
# Wrapper
# ---------------------------------------------------------------------------
def _rel_pos_bias_self_attn(w, seq_len):
    """Self-attn relative bias; equivalent to the pad/repeat/reshape trick:
    bias[i, j] = w[j - i + seq_len - 1]."""
    i = jnp.arange(seq_len)[:, None]
    j = jnp.arange(seq_len)[None, :]
    return jnp.take(w, j - i + seq_len - 1, axis=0)


def rtmcc_block_forward(x, params, *, s, eps=1e-5, use_rel_bias=True,
                        batch_block=None, vmem_limit_bytes=48 * 1024 * 1024):
    """RTMCCBlock forward (self-attn). x: (B, T, D) -> (B, T, Do)."""
    B, T, D = x.shape
    w_uv = params['w_uv']                                     # (2e+s, D) torch layout
    w_o = params['w_o']                                       # (Do, e)
    e = (w_uv.shape[0] - s) // 2
    Do = w_o.shape[0]
    shortcut = (D == Do) and ('res_scale' in params)

    f32 = jnp.float32
    # Pre-split / pre-transpose the weights once (outside the kernel).
    wu = jnp.transpose(w_uv[:e, :]).astype(f32)               # (D, e)
    wv = jnp.transpose(w_uv[e:2 * e, :]).astype(f32)          # (D, e)
    wb = jnp.transpose(w_uv[2 * e:, :]).astype(f32)           # (D, s)
    wo = jnp.transpose(w_o).astype(f32)                       # (e, Do)
    gamma = params['gamma'].astype(f32)                       # (2, s)
    beta = params['beta'].astype(f32)                         # (2, s)
    g = params['g'].reshape(1, 1).astype(f32)                 # (1, 1)

    if use_rel_bias:
        bias = _rel_pos_bias_self_attn(params['w'].astype(f32), T)   # (T, T)
    else:
        bias = jnp.zeros((T, T), f32)

    if shortcut:
        rs = params['res_scale'].reshape(1, D).astype(f32)    # (1, D)
    else:
        rs = jnp.zeros((1, 1), f32)                           # unused dummy

    # Batch tile: big enough to amortize per-step pipeline overhead, small
    # enough that the double-buffered activation footprint fits v7x's VMEM.
    if batch_block is None:
        per_b = 4 * T * (D + Do + 2 * e + s + T)              # f32 bytes / batch elem
        batch_block = max(1, min(B, 32, (4 << 20) // max(per_b, 1)))
    bb = batch_block
    grid = (pl.cdiv(B, bb),)

    kernel = functools.partial(_gau_kernel, eps=eps, sqrt_s=math.sqrt(s),
                               shortcut=shortcut)

    const2 = lambda i: (0, 0)
    out = pl.pallas_call(
        kernel,
        out_shape=jax.ShapeDtypeStruct((B, T, Do), x.dtype),
        grid_spec=pltpu.PrefetchScalarGridSpec(
            num_scalar_prefetch=0,
            grid=grid,
            in_specs=[
                pl.BlockSpec((bb, T, D), lambda i: (i, 0, 0)),   # x (tiled over batch)
                pl.BlockSpec(wu.shape, const2),                  # W_u   (resident)
                pl.BlockSpec(wv.shape, const2),                  # W_v   (resident)
                pl.BlockSpec(wb.shape, const2),                  # W_base(resident)
                pl.BlockSpec(wo.shape, const2),                  # W_o   (resident)
                pl.BlockSpec(gamma.shape, const2),               # gamma
                pl.BlockSpec(beta.shape, const2),                # beta
                pl.BlockSpec(bias.shape, const2),                # relative bias
                pl.BlockSpec(g.shape, const2),                   # ScaleNorm g
                pl.BlockSpec(rs.shape, const2),                  # residual Scale
            ],
            out_specs=pl.BlockSpec((bb, T, Do), lambda i: (i, 0, 0)),
        ),
        compiler_params=pltpu.CompilerParams(
            dimension_semantics=("parallel",),
            vmem_limit_bytes=vmem_limit_bytes,
        ),
    )(x, wu, wv, wb, wo, gamma, beta, bias, g, rs)
    return out


# ---------------------------------------------------------------------------
# Pure-JAX reference (mirrors the PyTorch forward exactly)
# ---------------------------------------------------------------------------
def rtmcc_block_reference(x, params, *, s, eps=1e-5, use_rel_bias=True):
    B, T, D = x.shape
    w_uv = params['w_uv']
    w_o = params['w_o']
    e = (w_uv.shape[0] - s) // 2
    Do = w_o.shape[0]
    hp = jax.lax.Precision.HIGHEST

    xf = x.astype(jnp.float32)
    norm = jnp.sqrt(jnp.sum(xf * xf, axis=-1, keepdims=True)) * (D ** -0.5)
    xn = xf / jnp.maximum(norm, eps) * params['g'][0]
    uv = jnp.einsum('btd,ed->bte', xn, w_uv, precision=hp)
    uv = uv * jax.nn.sigmoid(uv)
    u, v, base = uv[..., :e], uv[..., e:2 * e], uv[..., 2 * e:]
    q = base * params['gamma'][0] + params['beta'][0]
    k = base * params['gamma'][1] + params['beta'][1]
    qk = jnp.einsum('bqs,bks->bqk', q, k, precision=hp)
    if use_rel_bias:
        qk = qk + _rel_pos_bias_self_attn(params['w'].astype(jnp.float32), T)[None]
    kern = jnp.square(jnp.maximum(qk / math.sqrt(s), 0.0))
    out = u * jnp.einsum('bqk,bke->bqe', kern, v, precision=hp)
    out = jnp.einsum('bte,oe->bto', out, w_o, precision=hp)
    if D == Do and 'res_scale' in params:
        out = out + xf * params['res_scale']
    return out.astype(x.dtype)


if __name__ == "__main__":
    key = jax.random.PRNGKey(0)
    # Small shapes consistent with RTMCC: batch=2, num_token=8, hidden=32,
    # expansion_factor=2 (e=64), self-attn dim s=32.
    B, T, D, s_dim, expansion = 2, 8, 32, 32, 2
    e = D * expansion
    Do = D

    ks = jax.random.split(key, 6)
    x = jax.random.normal(ks[0], (B, T, D), dtype=jnp.float32)

    lim_uv = math.sqrt(6.0 / (D + 2 * e + s_dim))             # xavier_uniform
    lim_o = 1.0 / math.sqrt(e)                                # torch Linear default
    params = {
        'w_uv': jax.random.uniform(ks[1], (2 * e + s_dim, D), jnp.float32,
                                   -lim_uv, lim_uv),
        'w_o': jax.random.uniform(ks[2], (Do, e), jnp.float32, -lim_o, lim_o),
        'gamma': jax.random.uniform(ks[3], (2, s_dim), jnp.float32),
        'beta': jax.random.uniform(ks[4], (2, s_dim), jnp.float32),
        'w': jax.random.uniform(ks[5], (2 * T - 1,), jnp.float32),
        'g': jnp.ones((1,), jnp.float32),                     # ScaleNorm.g
        'res_scale': jnp.ones((D,), jnp.float32),             # Scale(dim).scale
    }

    y = rtmcc_block_forward(x, params, s=s_dim)
    y = jax.block_until_ready(y)

    y_ref = rtmcc_block_reference(x, params, s=s_dim)
    assert y.shape == (B, T, Do)
    max_diff = float(jnp.max(jnp.abs(y - y_ref)))
    assert bool(jnp.allclose(y, y_ref, atol=5e-2, rtol=5e-2)), \
        f"mismatch vs reference, max abs diff = {max_diff}"
    print("KERNEL_OK")
</pallas_src>

<mosaic_0001>
module attributes {stable_mosaic.version = 11 : i64} {
  func.func @_gau_kernel(%arg0: i32, %arg1: memref<2x8x32xf32, #tpu.memory_space<vmem>>, %arg2: memref<32x64xf32, #tpu.memory_space<vmem>>, %arg3: memref<32x64xf32, #tpu.memory_space<vmem>>, %arg4: memref<32x32xf32, #tpu.memory_space<vmem>>, %arg5: memref<64x32xf32, #tpu.memory_space<vmem>>, %arg6: memref<2x32xf32, #tpu.memory_space<vmem>>, %arg7: memref<2x32xf32, #tpu.memory_space<vmem>>, %arg8: memref<8x8xf32, #tpu.memory_space<vmem>>, %arg9: memref<1x1xf32, #tpu.memory_space<vmem>>, %arg10: memref<1x32xf32, #tpu.memory_space<vmem>>, %arg11: memref<2x8x32xf32, #tpu.memory_space<vmem>>) attributes {dimension_semantics = [#tpu.dimension_semantics<parallel>], iteration_bounds = array<i64: 1>, scalar_prefetch = 0 : i64, scratch_operands = 0 : i64, tpu.core_type = #tpu.core_type<tc>, window_params = [{transform_indices = @transform_0, window_bounds = array<i64: 2, 8, 32>}, {pipeline_mode = #tpu.pipeline_mode<synchronous>, transform_indices = @transform_1, window_bounds = array<i64: 32, 64>}, {pipeline_mode = #tpu.pipeline_mode<synchronous>, transform_indices = @transform_2, window_bounds = array<i64: 32, 64>}, {pipeline_mode = #tpu.pipeline_mode<synchronous>, transform_indices = @transform_3, window_bounds = array<i64: 32, 32>}, {pipeline_mode = #tpu.pipeline_mode<synchronous>, transform_indices = @transform_4, window_bounds = array<i64: 64, 32>}, {pipeline_mode = #tpu.pipeline_mode<synchronous>, transform_indices = @transform_5, window_bounds = array<i64: 2, 32>}, {pipeline_mode = #tpu.pipeline_mode<synchronous>, transform_indices = @transform_6, window_bounds = array<i64: 2, 32>}, {pipeline_mode = #tpu.pipeline_mode<synchronous>, transform_indices = @transform_7, window_bounds = array<i64: 8, 8>}, {pipeline_mode = #tpu.pipeline_mode<synchronous>, transform_indices = @transform_8, window_bounds = array<i64: 1, 1>}, {pipeline_mode = #tpu.pipeline_mode<synchronous>, transform_indices = @transform_9, window_bounds = array<i64: 1, 32>}, {transform_indices = @transform_10, window_bounds = array<i64: 2, 8, 32>}]} {
    %c0 = arith.constant 0 : index
    %c0_0 = arith.constant 0 : index
    %c0_1 = arith.constant 0 : index
    %0 = vector.load %arg1[%c0, %c0_0, %c0_1] : memref<2x8x32xf32, #tpu.memory_space<vmem>>, vector<2x8x32xf32>
    %1 = arith.mulf %0, %0 : vector<2x8x32xf32>
    %cst = arith.constant dense<0.000000e+00> : vector<2x8xf32>
    %2 = vector.multi_reduction <add>, %1, %cst [2] : vector<2x8x32xf32> to vector<2x8xf32>
    %3 = vector.shape_cast %2 : vector<2x8xf32> to vector<2x8x1xf32>
    %4 = math.sqrt %3 : vector<2x8x1xf32>
    %cst_2 = arith.constant 0.176776692 : f32
    %5 = vector.broadcast %cst_2 : f32 to vector<2x8x1xf32>
    %6 = arith.mulf %4, %5 : vector<2x8x1xf32>
    %cst_3 = arith.constant 9.99999974E-6 : f32
    %7 = vector.broadcast %cst_3 : f32 to vector<2x8x1xf32>
    %8 = arith.maximumf %6, %7 : vector<2x8x1xf32>
    %9 = vector.broadcast %8 : vector<2x8x1xf32> to vector<2x8x32xf32>
    %10 = arith.divf %0, %9 : vector<2x8x32xf32>
    %c0_4 = arith.constant 0 : index
    %c0_5 = arith.constant 0 : index
    %11 = vector.load %arg9[%c0_4, %c0_5] : memref<1x1xf32, #tpu.memory_space<vmem>>, vector<1x1xf32>
    %12 = vector.shape_cast %11 : vector<1x1xf32> to vector<1x1x1xf32>
    %13 = vector.broadcast %12 : vector<1x1x1xf32> to vector<2x8x32xf32>
    %14 = arith.mulf %10, %13 : vector<2x8x32xf32>
    %15 = vector.shape_cast %14 : vector<2x8x32xf32> to vector<16x32xf32>
    %c0_6 = arith.constant 0 : index
    %c0_7 = arith.constant 0 : index
    %16 = vector.load %arg2[%c0_6, %c0_7] : memref<32x64xf32, #tpu.memory_space<vmem>>, vector<32x64xf32>
    %cst_8 = arith.constant dense<0.000000e+00> : vector<16x64xf32>
    %17 = tpu.matmul %15, %16, %cst_8 {dimension_numbers = #tpu.dot_dimension_numbers<[1], [0], [0], [1], [0, 0, 1, 1], [], []>} : vector<16x32xf32>, vector<32x64xf32>, vector<16x64xf32> -> vector<16x64xf32>
    %c0_9 = arith.constant 0 : index
    %c0_10 = arith.constant 0 : index
    %18 = vector.load %arg3[%c0_9, %c0_10] : memref<32x64xf32, #tpu.memory_space<vmem>>, vector<32x64xf32>
    %cst_11 = arith.constant dense<0.000000e+00> : vector<16x64xf32>
    %19 = tpu.matmul %15, %18, %cst_11 {dimension_numbers = #tpu.dot_dimension_numbers<[1], [0], [0], [1], [0, 0, 1, 1], [], []>} : vector<16x32xf32>, vector<32x64xf32>, vector<16x64xf32> -> vector<16x64xf32>
    %c0_12 = arith.constant 0 : index
    %c0_13 = arith.constant 0 : index
    %20 = vector.load %arg4[%c0_12, %c0_13] : memref<32x32xf32, #tpu.memory_space<vmem>>, vector<32x32xf32>
    %cst_14 = arith.constant dense<0.000000e+00> : vector<16x32xf32>
    %21 = tpu.matmul %15, %20, %cst_14 {dimension_numbers = #tpu.dot_dimension_numbers<[1], [0], [0], [1], [0, 0, 1, 1], [], []>} : vector<16x32xf32>, vector<32x32xf32>, vector<16x32xf32> -> vector<16x32xf32>
    %22 = arith.negf %17 : vector<16x64xf32>
    %23 = math.exp %22 : vector<16x64xf32>
    %cst_15 = arith.constant 1.000000e+00 : f32
    %24 = vector.broadcast %cst_15 : f32 to vector<16x64xf32>
    %25 = arith.addf %24, %23 : vector<16x64xf32>
    %26 = arith.divf %24, %25 : vector<16x64xf32>
    %27 = arith.mulf %17, %26 : vector<16x64xf32>
    %28 = vector.shape_cast %27 : vector<16x64xf32> to vector<2x8x64xf32>
    %29 = arith.negf %19 : vector<16x64xf32>
    %30 = math.exp %29 : vector<16x64xf32>
    %cst_16 = arith.constant 1.000000e+00 : f32
    %31 = vector.broadcast %cst_16 : f32 to vector<16x64xf32>
    %32 = arith.addf %31, %30 : vector<16x64xf32>
    %33 = arith.divf %31, %32 : vector<16x64xf32>
    %34 = arith.mulf %19, %33 : vector<16x64xf32>
    %35 = vector.shape_cast %34 : vector<16x64xf32> to vector<2x8x64xf32>
    %36 = arith.negf %21 : vector<16x32xf32>
    %37 = math.exp %36 : vector<16x32xf32>
    %cst_17 = arith.constant 1.000000e+00 : f32
    %38 = vector.broadcast %cst_17 : f32 to vector<16x32xf32>
    %39 = arith.addf %38, %37 : vector<16x32xf32>
    %40 = arith.divf %38, %39 : vector<16x32xf32>
    %41 = arith.mulf %21, %40 : vector<16x32xf32>
    %42 = vector.shape_cast %41 : vector<16x32xf32> to vector<2x8x32xf32>
    %c0_18 = arith.constant 0 : index
    %c0_19 = arith.constant 0 : index
    %43 = vector.load %arg6[%c0_18, %c0_19] : memref<2x32xf32, #tpu.memory_space<vmem>>, vector<1x32xf32>
    %44 = vector.shape_cast %43 : vector<1x32xf32> to vector<1x1x32xf32>
    %45 = vector.broadcast %44 : vector<1x1x32xf32> to vector<2x8x32xf32>
    %46 = arith.mulf %42, %45 : vector<2x8x32xf32>
    %c0_20 = arith.constant 0 : index
    %c0_21 = arith.constant 0 : index
    %47 = vector.load %arg7[%c0_20, %c0_21] : memref<2x32xf32, #tpu.memory_space<vmem>>, vector<1x32xf32>
    %48 = vector.shape_cast %47 : vector<1x32xf32> to vector<1x1x32xf32>
    %49 = vector.broadcast %48 : vector<1x1x32xf32> to vector<2x8x32xf32>
    %50 = arith.addf %46, %49 : vector<2x8x32xf32>
    %c1 = arith.constant 1 : index
    %c0_22 = arith.constant 0 : index
    %51 = vector.load %arg6[%c1, %c0_22] : memref<2x32xf32, #tpu.memory_space<vmem>>, vector<1x32xf32>
    %52 = vector.shape_cast %51 : vector<1x32xf32> to vector<1x1x32xf32>
    %53 = vector.broadcast %52 : vector<1x1x32xf32> to vector<2x8x32xf32>
    %54 = arith.mulf %42, %53 : vector<2x8x32xf32>
    %c1_23 = arith.constant 1 : index
    %c0_24 = arith.constant 0 : index
    %55 = vector.load %arg7[%c1_23, %c0_24] : memref<2x32xf32, #tpu.memory_space<vmem>>, vector<1x32xf32>
    %56 = vector.shape_cast %55 : vector<1x32xf32> to vector<1x1x32xf32>
    %57 = vector.broadcast %56 : vector<1x1x32xf32> to vector<2x8x32xf32>
    %58 = arith.addf %54, %57 : vector<2x8x32xf32>
    "tpu.trace_start"() <{level = 10 : i32, message = "bqs,bks->bqk"}> : () -> ()
    %cst_25 = arith.constant dense<0.000000e+00> : vector<2x8x8xf32>
    %59 = tpu.matmul %50, %58, %cst_25 {dimension_numbers = #tpu.dot_dimension_numbers<[2], [2], [1], [1], [0, 0, 0, 1, 1, 1], [0], [0]>} : vector<2x8x32xf32>, vector<2x8x32xf32>, vector<2x8x8xf32> -> vector<2x8x8xf32>
    "tpu.trace_stop"() : () -> ()
    %c0_26 = arith.constant 0 : index
    %c0_27 = arith.constant 0 : index
    %60 = vector.load %arg8[%c0_26, %c0_27] : memref<8x8xf32, #tpu.memory_space<vmem>>, vector<8x8xf32>
    %61 = vector.shape_cast %60 : vector<8x8xf32> to vector<1x8x8xf32>
    %62 = vector.broadcast %61 : vector<1x8x8xf32> to vector<2x8x8xf32>
    %63 = arith.addf %59, %62 : vector<2x8x8xf32>
    %cst_28 = arith.constant 5.65685415 : f32
    %64 = vector.broadcast %cst_28 : f32 to vector<2x8x8xf32>
    %65 = arith.divf %63, %64 : vector<2x8x8xf32>
    %cst_29 = arith.constant 0.000000e+00 : f32
    %66 = vector.broadcast %cst_29 : f32 to vector<2x8x8xf32>
    %67 = arith.maximumf %65, %66 : vector<2x8x8xf32>
    %68 = arith.mulf %67, %67 : vector<2x8x8xf32>
    "tpu.trace_start"() <{level = 10 : i32, message = "bqk,bke->bqe"}> : () -> ()
    %cst_30 = arith.constant dense<0.000000e+00> : vector<2x8x64xf32>
    %69 = tpu.matmul %68, %35, %cst_30 {dimension_numbers = #tpu.dot_dimension_numbers<[2], [1], [1], [2], [0, 0, 0, 1, 1, 2], [0], [0]>} : vector<2x8x8xf32>, vector<2x8x64xf32>, vector<2x8x64xf32> -> vector<2x8x64xf32>
    "tpu.trace_stop"() : () -> ()
    %70 = arith.mulf %28, %69 : vector<2x8x64xf32>
    %71 = vector.shape_cast %70 : vector<2x8x64xf32> to vector<16x64xf32>
    %c0_31 = arith.constant 0 : index
    %c0_32 = arith.constant 0 : index
    %72 = vector.load %arg5[%c0_31, %c0_32] : memref<64x32xf32, #tpu.memory_space<vmem>>, vector<64x32xf32>
    %cst_33 = arith.constant dense<0.000000e+00> : vector<16x32xf32>
    %73 = tpu.matmul %71, %72, %cst_33 {dimension_numbers = #tpu.dot_dimension_numbers<[1], [0], [0], [1], [0, 0, 1, 1], [], []>} : vector<16x64xf32>, vector<64x32xf32>, vector<16x32xf32> -> vector<16x32xf32>
    %74 = vector.shape_cast %73 : vector<16x32xf32> to vector<2x8x32xf32>
    %c0_34 = arith.constant 0 : index
    %c0_35 = arith.constant 0 : index
    %75 = vector.load %arg10[%c0_34, %c0_35] : memref<1x32xf32, #tpu.memory_space<vmem>>, vector<1x32xf32>
    %76 = vector.shape_cast %75 : vector<1x32xf32> to vector<1x1x32xf32>
    %77 = vector.broadcast %76 : vector<1x1x32xf32> to vector<2x8x32xf32>
    %78 = arith.mulf %0, %77 : vector<2x8x32xf32>
    %79 = arith.addf %74, %78 : vector<2x8x32xf32>
    %c0_36 = arith.constant 0 : index
    %c0_37 = arith.constant 0 : index
    %c0_38 = arith.constant 0 : index
    %80 = vector.load %arg11[%c0_36, %c0_37, %c0_38] : memref<2x8x32xf32, #tpu.memory_space<vmem>>, vector<2x8x32xf32>
    tpu.vector_store %arg11[%c0_36, %c0_37, %c0_38], %79 {strides = array<i32>} : memref<2x8x32xf32, #tpu.memory_space<vmem>>, vector<2x8x32xf32>,
    return
  }
  func.func @transform_0(%arg0: i32) -> (i32, i32, i32) {
    %c0_i32 = arith.constant 0 : i32
    %c0_i32_0 = arith.constant 0 : i32
    %c0_i32_1 = arith.constant 0 : i32
    return %arg0, %c0_i32, %c0_i32_0 : i32, i32, i32
  }
  func.func @transform_1(%arg0: i32) -> (i32, i32) {
    %c0_i32 = arith.constant 0 : i32
    %c0_i32_0 = arith.constant 0 : i32
    %c0_i32_1 = arith.constant 0 : i32
    return %c0_i32, %c0_i32_0 : i32, i32
  }
  func.func @transform_2(%arg0: i32) -> (i32, i32) {
    %c0_i32 = arith.constant 0 : i32
    %c0_i32_0 = arith.constant 0 : i32
    %c0_i32_1 = arith.constant 0 : i32
    return %c0_i32, %c0_i32_0 : i32, i32
  }
  func.func @transform_3(%arg0: i32) -> (i32, i32) {
    %c0_i32 = arith.constant 0 : i32
    %c0_i32_0 = arith.constant 0 : i32
    %c0_i32_1 = arith.constant 0 : i32
    return %c0_i32, %c0_i32_0 : i32, i32
  }
  func.func @transform_4(%arg0: i32) -> (i32, i32) {
    %c0_i32 = arith.constant 0 : i32
    %c0_i32_0 = arith.constant 0 : i32
    %c0_i32_1 = arith.constant 0 : i32
    return %c0_i32, %c0_i32_0 : i32, i32
  }
  func.func @transform_5(%arg0: i32) -> (i32, i32) {
    %c0_i32 = arith.constant 0 : i32
    %c0_i32_0 = arith.constant 0 : i32
    %c0_i32_1 = arith.constant 0 : i32
    return %c0_i32, %c0_i32_0 : i32, i32
  }
  func.func @transform_6(%arg0: i32) -> (i32, i32) {
    %c0_i32 = arith.constant 0 : i32
    %c0_i32_0 = arith.constant 0 : i32
    %c0_i32_1 = arith.constant 0 : i32
    return %c0_i32, %c0_i32_0 : i32, i32
  }
  func.func @transform_7(%arg0: i32) -> (i32, i32) {
    %c0_i32 = arith.constant 0 : i32
    %c0_i32_0 = arith.constant 0 : i32
    %c0_i32_1 = arith.constant 0 : i32
    return %c0_i32, %c0_i32_0 : i32, i32
  }
  func.func @transform_8(%arg0: i32) -> (i32, i32) {
    %c0_i32 = arith.constant 0 : i32
    %c0_i32_0 = arith.constant 0 : i32
    %c0_i32_1 = arith.constant 0 : i32
    return %c0_i32, %c0_i32_0 : i32, i32
  }
  func.func @transform_9(%arg0: i32) -> (i32, i32) {
    %c0_i32 = arith.constant 0 : i32
    %c0_i32_0 = arith.constant 0 : i32
    %c0_i32_1 = arith.constant 0 : i32
    return %c0_i32, %c0_i32_0 : i32, i32
  }
  func.func @transform_10(%arg0: i32) -> (i32, i32, i32) {
    %c0_i32 = arith.constant 0 : i32
    %c0_i32_0 = arith.constant 0 : i32
    %c0_i32_1 = arith.constant 0 : i32
    return %arg0, %c0_i32, %c0_i32_0 : i32, i32, i32
  }
}

</mosaic_0001>

<bundles_post_ra>
// kernel: tpu_custom_call.1
= control target key start
LH: loop header
LB: loop body
LE: loop exit
PB: predicated region body
PF: predicated region fallthrough
CT: control target
= control target key end

     0   :  { %s1313_s0 = inlined_call_operand.hbm [shape: f32[2,8,32], index: 0, kind: input, shape index: {}]   ;;  %s1314_s1 = inlined_call_operand.vmem [shape: f32[32,64], index: 1, kind: input, shape index: {}]   ;;  %s1315_s2 = inlined_call_operand.vmem [shape: f32[32,64], index: 2, kind: input, shape index: {}]   ;;  %s1316_s3 = inlined_call_operand.vmem [shape: f32[32,32], index: 3, kind: input, shape index: {}]   ;;  %s1317_s4 = inlined_call_operand.vmem [shape: f32[64,32], index: 4, kind: input, shape index: {}]   ;;  %s1318_s5 = inlined_call_operand.vmem [shape: f32[2,32], index: 5, kind: input, shape index: {}]   ;;  %s1319_s6 = inlined_call_operand.vmem [shape: f32[2,32], index: 6, kind: input, shape index: {}]   ;;  %s1320_s7 = inlined_call_operand.vmem [shape: f32[8,8], index: 7, kind: input, shape index: {}]   ;;  %s1321_s8 = inlined_call_operand.<no memory space> [shape: f32[1,1], index: 8, kind: input, shape index: {}]   ;;  %s1322_s9 = inlined_call_operand.vmem [shape: f32[1,32], index: 9, kind: input, shape index: {}]   ;;  %s1323_s10 = inlined_call_operand.hbm [shape: f32[2,8,32], index: 10, kind: output, shape index: {}]  }
   0x1   :  { %v15_v0 = vstv %s1321_s8 }
   0x2   :  { %16 = vst [vmem:[#allocation2] sm:$0x1] %v15_v0 }
   0x3   :  { %17 = vsyncpa [#allocation4], 0 }
   0x4   :  { %18 = vsyncpa [#allocation5], 0  ;;  %s1102_s15 = smov [#allocation3]   ;;  %s1054_s19 = scalar_lea.hbm %s1313_s0, 256 }
   0x5   :  { %s24_s16 = sshll.u32 %s1102_s15, 4  ;;  %p1055_p0 = scmp.ne.s32.totalorder %s1313_s0, %s1054_s19  ;;  %s25_s16 = int_to_ptr.vmem [resolvable:$true] %s24_s16 }
   0x6   :  { %p1058_p1 = scmp.lt.u32.totalorder %s1054_s19, %s1313_s0 }
   0x8   :  { %p1060_p2 = pnand %p1058_p1, %p1055_p0 }
   0xa   :  { %1063 = shalt.err (!%p1060_p2)
}
   0xb   :  { %s1064_s8 = scalar_lea.vmem %s25_s16, 256  ;;  %p1069_p4 = scmp.lt.s32.totalorder %s25_s16, %s25_s16 }
   0xc   :  { %p1065_p3 = scmp.ne.s32.totalorder %s25_s16, %s1064_s8  ;;  %p1070_p5 = scmp.lt.s32.totalorder %s1064_s8, %s1064_s8 }
   0xe   :  { %p1071_p6 = por %p1070_p5, %p1069_p4 }
  0x10   :  { %p1072_p7 = pnand %p1071_p6, %p1065_p3 }
  0x12   :  { %1075 = shalt.err (!%p1072_p7)
}
  0x13   :  { %s1103_s24 = smov 128   ;;  %s1104_s25 = smov 8  }
  0x14   :  { %30 = dma.hbm_to_vmem [thread:$0]  %s1313_s0, 256, %s25_s16, [#allocation4], %s1103_s24, %s1103_s24, %s1104_s25  }
  0x15   :  { %1098 = dma.done.wait [#allocation4], 256  }
  0x16   :  { %1099 = vsyncadd [#allocation4], 4294967040  ;;  %v1105_v1 = vmov 0   ;;  %v1182_v2 = vld [vmem:[#allocation3] sm:$0xff]  ;;  %vm56_vm0 = vcmask 261120   ;;  %v1184_v3 = vld [vmem:[#allocation3 + $0x8] sm:$0xff] }
  0x17   :  { %1020 = vset.pattern.permute.xlu1 %v1105_v1  ;;  %1021 = vset.pattern.permute.xlu0 %v1105_v1  ;;  %v839_v4 = vld [vmem:[#allocation2] ss:$0 sm:$0xff]  ;;  %v54_v5 = vmul.f32 %v1182_v2, %v1182_v2  ;;  %v55_v6 = vmul.f32 %v1184_v3, %v1184_v3  ;;  %v98_v10 = vld [vmem:[%s1314_s1 + $0x8] sm:$0xff]  ;;  %v99_v15 = vld [vmem:[%s1314_s1 + $0x10] sm:$0xff]  ;;  %v1106_v50 = vmov 0.0   ;;  %vm1107_vm5 = vmmov 0  }
  0x18   :  { %92 = vperm.xlu1 %1020, %v839_v4   ;;  %v97_v9 = vld [vmem:[%s1314_s1] sm:$0xff]  ;;  %v262_v13 = vld [vmem:[%s1316_s3 + $0x8] sm:$0xff]  ;;  %v100_v16 = vld [vmem:[%s1314_s1 + $0x18] sm:$0xff]  ;;  %vm570_vm6 = vcmask 64512   ;;  %vm727_vm7 = vcmask 523264   ;;  %s1108_s29 = smov [#allocation6]  }
  0x19   :  { %v57_v7 = vsel %vm56_vm0, %v54_v5, 0.0  ;;  %v60_v8 = vsel %vm56_vm0, %v55_v6, 0.0  ;;  %v261_v11 = vld [vmem:[%s1316_s3] sm:$0xff]  ;;  %v973_v12 = vpack.c.bf16 %v98_v10, %v97_v9  ;;  %v977_v17 = vpack.c.bf16 %v100_v16, %v99_v15  ;;  %v263_v18 = vld [vmem:[%s1316_s3 + $0x10] sm:$0xff]  ;;  %v264_v19 = vld [vmem:[%s1316_s3 + $0x18] sm:$0xff]  ;;  %s827_s30 = sshll.u32 %s1108_s29, 4  ;;  %s828_s30 = int_to_ptr.vmem [resolvable:$true] %s827_s30 }
  0x1a   :  { %58 = vadd.xlane.f32.xlu0 %v57_v7  ;;  %v989_v14 = vpack.c.bf16 %v262_v13, %v261_v11  ;;  %v993_v20 = vpack.c.bf16 %v264_v19, %v263_v18  ;;  %v182_v21 = vld [vmem:[%s1315_s2] sm:$0xff]  ;;  %v183_v22 = vld [vmem:[%s1315_s2 + $0x8] sm:$0xff]  ;;  %v184_v45 = vld [vmem:[%s1315_s2 + $0x10] sm:$0xff]  ;;  %s1076_s11 = scalar_lea.vmem %s828_s30, 256  ;;  %p1081_p9 = scmp.lt.s32.totalorder %s828_s30, %s828_s30 }
  0x1b   :  { %974 = vmatprep.subr.bf16.mxu1 %v973_v12  ;;  %v981_v23 = vpack.c.bf16 %v183_v22, %v182_v21  ;;  %v185_v46 = vld [vmem:[%s1315_s2 + $0x18] sm:$0xff]  ;;  %v854_v9 = vld [vmem:[%s1318_s5 + $0x1] ss:$0 sm:$0xff]  ;;  %v852_v11 = vld [vmem:[%s1318_s5] ss:$0 sm:$0xff]  ;;  %p1077_p8 = scmp.ne.s32.totalorder %s828_s30, %s1076_s11  ;;  %p1082_p10 = scmp.lt.s32.totalorder %s1076_s11, %s1076_s11 }
  0x1c   :  { %976 = vmatpush3.bf16.msra.mxu1 %v973_v12  ;;  %990 = vmatprep.subr.bf16.mxu0 %v989_v14  ;;  %v985_v49 = vpack.c.bf16 %v185_v46, %v184_v45  ;;  %v855_v13 = vld [vmem:[%s1319_s6 + $0x1] ss:$0 sm:$0xff]  ;;  %v853_v16 = vld [vmem:[%s1319_s6] ss:$0 sm:$0xff]  ;;  %v724_v45 = vld [vmem:[%s1317_s4 + $0x28] sm:$0xff] }
  0x1d   :  { %992 = vmatpush3.bf16.msra.mxu0 %v989_v14  ;;  %978 = vmatprep.subr.bf16.mxu1 %v977_v17  ;;  %p1083_p11 = por %p1082_p10, %p1081_p9 }
  0x1e   :  { %61 = vadd.xlane.f32.xlu0 %v60_v8  ;;  %994 = vmatprep.subr.bf16.mxu0 %v993_v20 }
  0x1f   :  { %p1084_p12 = pnand %p1083_p11, %p1077_p8 }
  0x20   :  { %980 = vmatpush3.bf16.msra.mxu1 %v977_v17 }
  0x21   :  { %996 = vmatpush3.bf16.msra.mxu0 %v993_v20  ;;  %982 = vmatprep.subr.bf16.mxu1 %v981_v23 }
  0x22   :  { %944 = vmatprep.subr.mxu0 %v1106_v50 }
  0x97   :  { %v93_v41 = vpop.permute.xlu1 %92 }
  0xa7   :  { %v59_v24 = vpop.xlane.xlu0 %58 }
  0xa8   :  { %1022 = vrsqrt.f32 %v59_v24  ;;  %vm65_vm1 = vcmp.eq.f32.partialorder %v59_v24, inf  ;;  %v68_v28 = vand.u32 2147483648, %v59_v24  ;;  %vm67_vm2 = vcmp.eq.f32.partialorder %v59_v24, 0.0 }
  0xab   :  { %v62_v25 = vpop.xlane.xlu0 %61 }
  0xac   :  { %1024 = vrsqrt.f32 %v62_v25  ;;  %vm72_vm3 = vcmp.eq.f32.partialorder %v62_v25, inf  ;;  %v75_v34 = vand.u32 2147483648, %v62_v25  ;;  %vm74_vm4 = vcmp.eq.f32.partialorder %v62_v25, 0.0 }
  0xb2   :  { %v1023_v26 = vpop.eup %1022 }
  0xb3   :  { %v64_v27 = vmul.f32 %v1023_v26, %v59_v24 }
  0xb5   :  { %v66_v29 = vsel %vm65_vm1, %v59_v24, %v64_v27  ;;  %v719_v27 = vld [vmem:[%s1317_s4] sm:$0xff] }
  0xb6   :  { %v1025_v30 = vpop.eup %1024  ;;  %v69_v31 = vsel %vm67_vm2, %v68_v28, %v66_v29  ;;  %v720_v28 = vld [vmem:[%s1317_s4 + $0x8] sm:$0xff] }
  0xb7   :  { %v77_v32 = vmul.f32 0.17677669, %v69_v31  ;;  %v71_v33 = vmul.f32 %v1025_v30, %v62_v25  ;;  %v997_v29 = vpack.c.bf16 %v720_v28, %v719_v27  ;;  %v410_v30 = vld [vmem:[%s1320_s7] sm:$0xff] }
  0xb9   :  { %v73_v35 = vsel %vm72_vm3, %v62_v25, %v71_v33  ;;  %v79_v36 = vmax.f32 %v77_v32, 1e-05 }
  0xba   :  { %v76_v37 = vsel %vm74_vm4, %v75_v34, %v73_v35 }
  0xbb   :  { %v78_v38 = vmul.f32 0.17677669, %v76_v37  ;;  %1026 = vrcp.f32 %v79_v36  ;;  %v721_v36 = vld [vmem:[%s1317_s4 + $0x10] sm:$0xff]  ;;  %v722_v37 = vld [vmem:[%s1317_s4 + $0x18] sm:$0xff] }
  0xbd   :  { %v80_v39 = vmax.f32 %v78_v38, 1e-05 }
  0xbf   :  { %1028 = vrcp.f32 %v80_v39 }
  0xc5   :  { %v1027_v40 = vpop.eup %1026 }
  0xc6   :  { %v82_v42 = vmul.f32 %v1027_v40, %v1182_v2 }
  0xc8   :  { %v95_v43 = vmul.f32 %v93_v41, %v82_v42 }
  0xc9   :  { %v1029_v44 = vpop.eup %1028 }
  0xca   :  { %v84_v47 = vmul.f32 %v1029_v44, %v1184_v3  ;;  %909 = vmatprep.mubr.msk.f32.mxu1 %vm56_vm0, %v95_v43  ;;  %931 = vmatprep.mubr.msk.f32.mxu0 %vm56_vm0, %v95_v43  ;;  %v723_v44 = vld [vmem:[%s1317_s4 + $0x20] sm:$0xff] }
  0xcc   :  { %v96_v48 = vmul.f32 %v93_v41, %v84_v47 }
  0xce   :  { %910 = vmatmul.mubr.msk.f32.vlgmr.msra.gmra.mrb[0].mxu1 %vm56_vm0, %v96_v48  ;;  %932 = vmatmul.mubr.msk.f32.vlgmr.msra.gmra.mrb[0].mxu0 %vm56_vm0, %v96_v48 }
  0xcf   :  { %984 = vmatpush3.bf16.msra.mxu1 %v981_v23  ;;  %920 = vmatprep.mubr.msk.f32.mxu1 %vm56_vm0, %v95_v43  ;;  %v1001_v43 = vpack.c.bf16 %v722_v37, %v721_v36 }
  0xd0   :  { %986 = vmatprep.subr.bf16.mxu1 %v985_v49  ;;  %946 = vmatprep.mubr.msk.f32.mxu0 %vm1107_vm5, %v1106_v50 }
  0xd3   :  { %988 = vmatpush3.bf16.msra.mxu1 %v985_v49  ;;  %v725_v49 = vld [vmem:[%s1317_s4 + $0x30] sm:$0xff] }
  0xd4   :  { %934 = vmatprep.subr.mxu1 %v1106_v50 }
  0xd6   :  { %921 = vmatmul.mubr.msk.f32.vlgmr.msra.gmra.mrb[2].mxu1 %vm56_vm0, %v96_v48  ;;  %v1005_v48 = vpack.c.bf16 %v724_v45, %v723_v44 }
  0xd7   :  { %936 = vmatprep.mubr.msk.f32.mxu1 %vm1107_vm5, %v1106_v50 }
 0x1a1   :  { %v1238_v51 = vpop.f32.mrb[0].mxu1  ;;  %v933_v52 = vpop.f32.mrb[0].mxu0 }
 0x1a2   :  { %v851_v53 = vmul.f32 -1.442695, %v933_v52  ;;  %v1240_v54 = vpop.f32.mrb[1].mxu1  ;;  %v331_v55 = vpop.f32.mrb[1].mxu0 }
 0x1a3   :  { %v850_v56 = vmul.f32 -1.442695, %v331_v55 }
 0x1a4   :  { %1030 = vpow2.f32 %v851_v53  ;;  %v846_v53 = vmul.f32 -1.442695, %v1240_v54 }
 0x1a5   :  { %1032 = vpow2.f32 %v850_v56 }
 0x1a9   :  { %v922_v57 = vpop.f32.mrb[2].mxu1 }
 0x1aa   :  { %v849_v58 = vmul.f32 -1.442695, %v922_v57  ;;  %v252_v59 = vpop.f32.mrb[3].mxu1 }
 0x1ab   :  { %v848_v60 = vmul.f32 -1.442695, %v252_v59 }
 0x1ac   :  { %1034 = vpow2.f32 %v849_v58 }
 0x1ad   :  { %1036 = vpow2.f32 %v848_v60 }
 0x1ae   :  { %v1031_v61 = vpop.eup %1030 }
 0x1af   :  { %v375_v62 = vadd.f32 1.0, %v1031_v61  ;;  %v1033_v63 = vpop.eup %1032 }
 0x1b0   :  { %v374_v0 = vadd.f32 1.0, %v1033_v63 }
 0x1b1   :  { %1038 = vrcp.f32 %v375_v62 }
 0x1b2   :  { %1040 = vrcp.f32 %v374_v0 }
 0x1b6   :  { %v1035_v1 = vpop.eup %1034 }
 0x1b7   :  { %v1037_v4 = vpop.eup %1036  ;;  %v361_v6 = vadd.f32 1.0, %v1035_v1 }
 0x1b8   :  { %v360_v5 = vadd.f32 1.0, %v1037_v4 }
 0x1ba   :  { %1042 = vrcp.f32 %v360_v5 }
 0x1bb   :  { %v1039_v7 = vpop.eup %1038  ;;  %1044 = vrcp.f32 %v361_v6 }
 0x1bc   :  { %v1041_v8 = vpop.eup %1040  ;;  %v381_v10 = vmul.f32 %v1039_v7, %v933_v52  ;;  %1046 = vpow2.f32 %v846_v53 }
 0x1bd   :  { %v380_v12 = vmul.f32 %v1041_v8, %v331_v55  ;;  %v847_v55 = vmul.f32 -1.442695, %v1238_v51  ;;  %v864_v8 = vld [vmem:[%s1322_s9] ss:$0 sm:$0xff] }
 0x1be   :  { %v402_v17 = vmul.f32 %v854_v9, %v381_v10  ;;  %v388_v21 = vmul.f32 %v852_v11, %v381_v10 }
 0x1bf   :  { %v401_v14 = vmul.f32 %v854_v9, %v380_v12  ;;  %v387_v15 = vmul.f32 %v852_v11, %v380_v12  ;;  %1048 = vpow2.f32 %v847_v55  ;;  %v817_v9 = vmul.f32 %v864_v8, %v1184_v3 }
 0x1c0   :  { %v409_v23 = vadd.f32 %v855_v13, %v402_v17  ;;  %v395_v25 = vadd.f32 %v853_v16, %v388_v21 }
 0x1c1   :  { %v408_v18 = vadd.f32 %v855_v13, %v401_v14  ;;  %v394_v22 = vadd.f32 %v853_v16, %v387_v15 }
 0x1c3   :  { %935 = vmatpush3.xpose.msk.msra.mxu1 %vm56_vm0, %v408_v18 }
 0x1c4   :  { %v1043_v19 = vpop.eup %1042  ;;  %939 = vmatprep.subr.mxu1 %v1106_v50 }
 0x1c5   :  { %v366_v20 = vmul.f32 %v1043_v19, %v252_v59  ;;  %v1045_v24 = vpop.eup %1044 }
 0x1c6   :  { %937 = vmatmul.mubr.msk.f32.vlgmr.msra.gmra.mrb[4].mxu1 %vm56_vm0, %v394_v22  ;;  %v367_v26 = vmul.f32 %v1045_v24, %v922_v57  ;;  %v1047_v56 = vpop.eup %1046 }
 0x1c7   :  { %945 = vmatpush3.msra.mxu0 %v366_v20  ;;  %940 = vmatpush3.xpose.msk.msra.mxu1 %vm56_vm0, %v409_v23  ;;  %v346_v57 = vadd.f32 1.0, %v1047_v56 }
 0x1c8   :  { %941 = vmatprep.mubr.msk.f32.mxu1 %vm1107_vm5, %v1106_v50  ;;  %949 = vmatprep.subr.mxu1 %v1106_v50 }
 0x1c9   :  { %998 = vmatprep.subr.bf16.mxu0 %v997_v29  ;;  %v1049_v58 = vpop.eup %1048  ;;  %1050 = vrcp.f32 %v346_v57 }
 0x1ca   :  { %942 = vmatmul.mubr.msk.f32.vlgmr.msra.gmra.mrb[6].mxu1 %vm56_vm0, %v395_v25  ;;  %v347_v59 = vadd.f32 1.0, %v1049_v58 }
 0x1cb   :  { %950 = vmatpush3.msra.mxu1 %v367_v26  ;;  %951 = vmatprep.mubr.msk.f32.mxu1 %vm1107_vm5, %v1106_v50  ;;  %v726_v50 = vld [vmem:[%s1317_s4 + $0x38] sm:$0xff] }
 0x1cc   :  { %v1009_v52 = vpack.c.bf16 %v726_v50, %v725_v49  ;;  %1052 = vrcp.f32 %v347_v59 }
 0x1d3   :  { %v1051_v60 = vpop.eup %1050 }
 0x1d4   :  { %v352_v61 = vmul.f32 %v1051_v60, %v1240_v54  ;;  %v816_v54 = vmul.f32 %v864_v8, %v1182_v2 }
 0x1d6   :  { %v1053_v62 = vpop.eup %1052 }
 0x1d7   :  { %v353_v4 = vmul.f32 %v1053_v62, %v1238_v51 }
 0x299   :  { %v483_v31 = vpop.f32.mrb[4].mxu1 }
 0x29a   :  { %v484_v32 = vadd.f32 %v483_v31, %v410_v30  ;;  %v938_v33 = vpop.f32.mrb[5].mxu1 }
 0x29c   :  { %v564_v34 = vmul.f32 0.17677669, %v484_v32 }
 0x29d   :  { %v559_v35 = vpop.f32.mrb[6].mxu1 }
 0x29e   :  { %v566_v38 = vmax.f32 %v564_v34, 0.0  ;;  %v560_v39 = vadd.f32 %v559_v35, %v410_v30  ;;  %v943_v40 = vpop.f32.mrb[7].mxu1 }
 0x2a0   :  { %v568_v41 = vmul.f32 %v566_v38, %v566_v38  ;;  %v565_v42 = vmul.f32 0.17677669, %v560_v39 }
 0x2a2   :  { %v567_v46 = vmax.f32 %v565_v42, 0.0  ;;  %947 = vmatmul.mubr.msk.f32.vlgmr.msra.gmra.mrb[2].mxu0 %vm570_vm6, %v568_v41 }
 0x2a3   :  { %1000 = vmatpush3.bf16.msra.mxu0 %v997_v29 }
 0x2a4   :  { %v569_v47 = vmul.f32 %v567_v46, %v567_v46  ;;  %1002 = vmatprep.subr.bf16.mxu0 %v1001_v43 }
 0x2a6   :  { %952 = vmatmul.mubr.msk.f32.vlgmr.msra.gmra.mrb[8].mxu1 %vm570_vm6, %v569_v47 }
 0x2a7   :  { %1004 = vmatpush3.bf16.msra.mxu0 %v1001_v43 }
 0x2a8   :  { %1006 = vmatprep.subr.bf16.mxu0 %v1005_v48 }
 0x2ab   :  { %1008 = vmatpush3.bf16.msra.mxu0 %v1005_v48 }
 0x2ac   :  { %1010 = vmatprep.subr.bf16.mxu0 %v1009_v52 }
 0x2af   :  { %1012 = vmatpush3.bf16.msra.mxu0 %v1009_v52 }
 0x375   :  { %v640_v63 = vpop.f32.mrb[2].mxu0 }
 0x376   :  { %v717_v0 = vmul.f32 %v640_v63, %v352_v61  ;;  %v948_v1 = vpop.f32.mrb[3].mxu0 }
 0x378   :  { %970 = vmatprep.mubr.msk.f32.mxu0 %vm727_vm7, %v717_v0 }
 0x379   :  { %v713_v5 = vpop.f32.mrb[8].mxu1 }
 0x37a   :  { %v718_v6 = vmul.f32 %v713_v5, %v353_v4  ;;  %v953_v7 = vpop.f32.mrb[9].mxu1 }
 0x37c   :  { %971 = vmatmul.mubr.msk.f32.vlgmr.msra.gmra.mrb[4].mxu0 %vm727_vm7, %v718_v6 }
 0x44f   :  { %v972_v10 = vpop.f32.mrb[4].mxu0 }
 0x450   :  { %v819_v11 = vadd.f32 %v972_v10, %v817_v9  ;;  %v800_v12 = vpop.f32.mrb[5].mxu0 }
 0x451   :  { %v818_v13 = vadd.f32 %v816_v54, %v800_v12 }
 0x452   :  { %821 = vst.msk [vmem:[#allocation6 + $0x8] sm:$0xff] %vm56_vm0, %v819_v11 }
 0x453   :  { %820 = vst.msk [vmem:[#allocation6] sm:$0xff] %vm56_vm0, %v818_v13 }
 0x454   :  { %1087 = shalt.err (!%p1084_p12)
}
 0x455   :  { %s1088_s13 = scalar_lea.hbm %s1323_s10, 256 }
 0x456   :  { %p1089_p13 = scmp.ne.s32.totalorder %s1323_s10, %s1088_s13  ;;  %p1092_p0 = scmp.lt.u32.totalorder %s1088_s13, %s1323_s10 }
 0x458   :  { %p1094_p1 = pnand %p1092_p0, %p1089_p13 }
 0x45a   :  { %1097 = shalt.err (!%p1094_p1)
}
 0x45b   :  { %833 = dma.vmem_to_hbm [thread:$0]  %s828_s30, 256, %s1323_s10, [#allocation5], %s1103_s24, %s1103_s24, %s1104_s25  }
 0x45c   :  { %1100 = dma.done.wait [#allocation5], 256  }
 0x45d   :  { %1101 = vsyncadd [#allocation5], 4294967040 }
 0x45e   :  { %837 = vsyncpa [#allocation4], 1 }
 0x45f   :  { %838 = vsyncpa [#allocation5], 1 }

</bundles_post_ra>
